<compile_context>
chip_gen: v6e
topology: v6e:2x2x1
jax: 0.10.0
libtpu: 0.0.40
codegen_flags: <defaults>
</compile_context>

<pallas_src>
import functools

import jax
import jax.numpy as jnp
from jax.experimental import pallas as pl
from jax.experimental.pallas import tpu as pltpu

_NEG_INF = -1e30  # large finite mask value (safe for f32 softmax)


def _pick_tile(dim, target, align):
    """Largest `align`-aligned divisor of `dim` that is <= `target`.

    Falls back to the full dimension (always a layout-legal block) when no
    aligned divisor exists.  Large divisor tiles (256-512) fill the 256x256
    MXUs on v6e/v7x while the working sets chosen below stay under the
    smallest default scoped-VMEM limit (16 MiB on v5e), so no explicit
    vmem_limit_bytes override is needed.
    """
    if dim <= target:
        return dim
    t = (target // align) * align
    while t >= align:
        if dim % t == 0:
            return t
        t -= align
    # TODO(synk): pad awkward dims to a 128 multiple instead of taking the
    #             whole dim as one block (can pressure v7x's 64 MiB VMEM).
    return dim


# ---------------------------------------------------------------------------
# Linear:  out = x @ W (+ b)   — tiled matmul, f32 accumulator in VMEM scratch.
# ---------------------------------------------------------------------------
def _linear_bias_kernel(x_ref, w_ref, b_ref, o_ref, acc_ref):
    @pl.when(pl.program_id(2) == 0)
    def _():
        acc_ref[...] = jnp.zeros_like(acc_ref)

    acc_ref[...] += jnp.dot(x_ref[...], w_ref[...],
                            preferred_element_type=jnp.float32)

    @pl.when(pl.program_id(2) == pl.num_programs(2) - 1)
    def _():
        o_ref[...] = (acc_ref[...] + b_ref[...]).astype(o_ref.dtype)


def _linear_nobias_kernel(x_ref, w_ref, o_ref, acc_ref):
    @pl.when(pl.program_id(2) == 0)
    def _():
        acc_ref[...] = jnp.zeros_like(acc_ref)

    acc_ref[...] += jnp.dot(x_ref[...], w_ref[...],
                            preferred_element_type=jnp.float32)

    @pl.when(pl.program_id(2) == pl.num_programs(2) - 1)
    def _():
        o_ref[...] = acc_ref[...].astype(o_ref.dtype)


def linear_pallas(x, w, b=None, *, tm=256, tn=256, tk=512):
    M, K = x.shape
    _, N = w.shape
    tm = _pick_tile(M, tm, 8)
    tn = _pick_tile(N, tn, 128)
    tk = _pick_tile(K, tk, 128)
    grid = (M // tm, N // tn, K // tk)

    x_spec = pl.BlockSpec((tm, tk), lambda i, j, k: (i, k))
    w_spec = pl.BlockSpec((tk, tn), lambda i, j, k: (k, j))
    o_spec = pl.BlockSpec((tm, tn), lambda i, j, k: (i, j))
    params = pltpu.CompilerParams(
        dimension_semantics=("parallel", "parallel", "arbitrary"))

    if b is None:
        # No zeros-bias DMA / epilogue add on the qkv_bias=False path.
        return pl.pallas_call(
            _linear_nobias_kernel,
            out_shape=jax.ShapeDtypeStruct((M, N), x.dtype),
            grid=grid,
            in_specs=[x_spec, w_spec],
            out_specs=o_spec,
            scratch_shapes=[pltpu.VMEM((tm, tn), jnp.float32)],
            compiler_params=params,
        )(x, w)

    b2 = b.reshape(1, N).astype(jnp.float32)
    return pl.pallas_call(
        _linear_bias_kernel,
        out_shape=jax.ShapeDtypeStruct((M, N), x.dtype),
        grid=grid,
        in_specs=[x_spec, w_spec,
                  pl.BlockSpec((1, tn), lambda i, j, k: (0, j))],
        out_specs=o_spec,
        scratch_shapes=[pltpu.VMEM((tm, tn), jnp.float32)],
        compiler_params=params,
    )(x, w, b2)


# ---------------------------------------------------------------------------
# Flash-style causal attention over packed (batch*heads), online softmax.
# ---------------------------------------------------------------------------
def _flash_causal_kernel(q_ref, k_ref, v_ref, o_ref,
                         qs_sc, m_sc, l_sc, acc_sc, *, scale, tq, tk):
    qi = pl.program_id(1)
    ki = pl.program_id(2)

    @pl.when(ki == 0)
    def _():
        # Fold 1/sqrt(head_dim) into Q once per query block (hoisted out of
        # the key loop) and reset the online-softmax state.
        qs_sc[...] = q_ref[...] * jnp.asarray(scale, q_ref.dtype)
        m_sc[...] = jnp.full(m_sc.shape, _NEG_INF, m_sc.dtype)
        l_sc[...] = jnp.zeros(l_sc.shape, l_sc.dtype)
        acc_sc[...] = jnp.zeros(acc_sc.shape, acc_sc.dtype)

    def scores():
        # Contraction on the last dims: no XLU transpose of the K tile.
        return jnp.einsum("bqd,bkd->bqk", qs_sc[...], k_ref[...],
                          preferred_element_type=jnp.float32)

    def online_softmax_update(s):
        m_prev = m_sc[...]
        m_new = jnp.maximum(m_prev, s.max(axis=-1, keepdims=True))
        alpha = jnp.exp(m_prev - m_new)
        p = jnp.exp(s - m_new)
        l_sc[...] = alpha * l_sc[...] + p.sum(axis=-1, keepdims=True)
        acc_sc[...] = alpha * acc_sc[...] + jnp.einsum(
            "bqk,bkd->bqd", p.astype(v_ref.dtype), v_ref[...],
            preferred_element_type=jnp.float32)
        m_sc[...] = m_new

    q_first = qi * tq
    q_last = qi * tq + (tq - 1)
    k_first = ki * tk
    k_last = ki * tk + (tk - 1)

    # Fully-unmasked key block (strictly at/below the diagonal): skip the
    # iota/compare/select masking entirely (saves VALU work on the common path).
    @pl.when(k_last <= q_first)
    def _():
        online_softmax_update(scores())

    # Block straddling the causal diagonal: apply the mask.
    @pl.when(jnp.logical_and(k_last > q_first, k_first <= q_last))
    def _():
        s = scores()
        row = q_first + jax.lax.broadcasted_iota(jnp.int32, s.shape, 1)
        col = k_first + jax.lax.broadcasted_iota(jnp.int32, s.shape, 2)
        online_softmax_update(jnp.where(col <= row, s, jnp.float32(_NEG_INF)))

    # Blocks entirely above the diagonal: no compute, and (thanks to the
    # clamped K/V index_map in the wrapper) no DMA either.

    @pl.when(ki == pl.num_programs(2) - 1)
    def _():
        l = l_sc[...]
        r = pl.reciprocal(l, approx=True)   # EUP slot (vrcp)
        r = r * (2.0 - l * r)               # one Newton step -> ~f32 precision
        o_ref[...] = (acc_sc[...] * r).astype(o_ref.dtype)


def causal_attention_pallas(q, k, v, scale):
    """q, k, v: (B*H, S, Dh) -> (B*H, S, Dh), causal softmax attention."""
    BH, S, Dh = q.shape
    tq = _pick_tile(S, 256, 128)
    tk = tq

    # Pack several batch*head slices per grid step (amortizes per-step grid
    # overhead and batches the MXU work), but keep a parallel grid extent >= 2
    # when possible so both v7x TensorCores get work.
    if BH <= 8:
        bb = BH
    else:
        bb = next(c for c in (8, 4, 2, 1) if BH % c == 0)
    if S // tq == 1:
        while bb > 1 and BH // bb < 2 and bb % 2 == 0:
            bb //= 2

    grid = (BH // bb, S // tq, S // tk)

    def qo_index_map(b, i, j):
        return (b, i, 0)

    def kv_index_map(b, i, j):
        # Clamp fully-masked (above-diagonal) key blocks to the last useful
        # block: an unchanged block index makes Pallas skip the HBM->VMEM DMA,
        # cutting causal K/V traffic roughly in half.
        return (b, jnp.minimum(j, (i * tq + tq - 1) // tk), 0)

    kernel = functools.partial(_flash_causal_kernel, scale=scale, tq=tq, tk=tk)
    return pl.pallas_call(
        kernel,
        out_shape=jax.ShapeDtypeStruct((BH, S, Dh), q.dtype),
        grid=grid,
        in_specs=[
            pl.BlockSpec((bb, tq, Dh), qo_index_map),
            pl.BlockSpec((bb, tk, Dh), kv_index_map),
            pl.BlockSpec((bb, tk, Dh), kv_index_map),
        ],
        # TODO(synk): for head_dim < 128 the output stores are lane-masked;
        #             padding / packing heads to a 128-wide last dim would
        #             help real shapes.
        out_specs=pl.BlockSpec((bb, tq, Dh), qo_index_map),
        scratch_shapes=[
            pltpu.VMEM((bb, tq, Dh), q.dtype),      # scaled Q (hoisted)
            pltpu.VMEM((bb, tq, 1), jnp.float32),   # running max m
            pltpu.VMEM((bb, tq, 1), jnp.float32),   # running denom l
            pltpu.VMEM((bb, tq, Dh), jnp.float32),  # output accumulator
        ],
        compiler_params=pltpu.CompilerParams(
            dimension_semantics=("parallel", "parallel", "arbitrary")),
    )(q, k, v)


# ---------------------------------------------------------------------------
# Output projection consuming the per-head context directly:
#   out[b, s, :] = sum_h ctx[b, h, s, :] @ W_proj[h*Dh:(h+1)*Dh, :] + b
# The head-merge transpose is absorbed into the input BlockSpec (head axis =
# K-reduction grid axis), so no XLA transpose / extra HBM round trip.
# ---------------------------------------------------------------------------
def _proj_from_heads_kernel(x_ref, w_ref, b_ref, o_ref, acc_ref):
    h = pl.program_id(3)

    @pl.when(h == 0)
    def _():
        acc_ref[...] = jnp.zeros_like(acc_ref)

    acc_ref[...] += jnp.dot(x_ref[0, 0], w_ref[...],
                            preferred_element_type=jnp.float32)

    @pl.when(h == pl.num_programs(3) - 1)
    def _():
        o_ref[0] = (acc_ref[...] + b_ref[...]).astype(o_ref.dtype)


def proj_from_heads_pallas(ctx, w, b, *, tm=256, tn=256):
    B, H, S, Dh = ctx.shape
    N = w.shape[1]
    tm = _pick_tile(S, tm, 8)
    tn = _pick_tile(N, tn, 128)
    b2 = b.reshape(1, N).astype(jnp.float32)
    grid = (B, S // tm, N // tn, H)
    return pl.pallas_call(
        _proj_from_heads_kernel,
        out_shape=jax.ShapeDtypeStruct((B, S, N), ctx.dtype),
        grid=grid,
        in_specs=[
            pl.BlockSpec((1, 1, tm, Dh), lambda b_, i, j, h: (b_, h, i, 0)),
            pl.BlockSpec((Dh, tn), lambda b_, i, j, h: (h, j)),
            pl.BlockSpec((1, tn), lambda b_, i, j, h: (0, j)),
        ],
        out_specs=pl.BlockSpec((1, tm, tn), lambda b_, i, j, h: (b_, i, j)),
        scratch_shapes=[pltpu.VMEM((tm, tn), jnp.float32)],
        compiler_params=pltpu.CompilerParams(
            dimension_semantics=("parallel", "parallel", "parallel",
                                 "arbitrary")),
    )(ctx, w, b2)


# ---------------------------------------------------------------------------
# Full module forward: combined QKV -> causal MHA -> output projection.
# ---------------------------------------------------------------------------
def mha_combined_qkv_forward(x, w_qkv, b_qkv, w_proj, b_proj, num_heads):
    B, S, d_in = x.shape
    d_out = w_proj.shape[1]
    head_dim = d_out // num_heads
    scale = head_dim ** -0.5

    # 1) combined QKV projection
    qkv = linear_pallas(x.reshape(B * S, d_in), w_qkv, b_qkv)     # (B*S, 3*d_out)
    qkv = qkv.reshape(B, S, 3, num_heads, head_dim)
    # TODO(synk): this head-split transpose is still one XLA HBM round trip;
    #             absorbing it would need sub-(8,128) blocks on the head axis.
    qkv = jnp.transpose(qkv, (2, 0, 3, 1, 4))                     # (3, B, H, S, Dh)
    q = qkv[0].reshape(B * num_heads, S, head_dim)
    k = qkv[1].reshape(B * num_heads, S, head_dim)
    v = qkv[2].reshape(B * num_heads, S, head_dim)

    # 2) causal multi-head attention
    ctx = causal_attention_pallas(q, k, v, scale)                 # (B*H, S, Dh)
    ctx = ctx.reshape(B, num_heads, S, head_dim)

    # 3) output projection (bias=True in the PyTorch module); the head-merge
    #    transpose is absorbed into the projection kernel's BlockSpec.
    if head_dim % 8 == 0:
        out = proj_from_heads_pallas(ctx, w_proj, b_proj)         # (B, S, d_out)
    else:
        merged = jnp.transpose(ctx, (0, 2, 1, 3)).reshape(B * S, d_out)
        out = linear_pallas(merged, w_proj, b_proj).reshape(B, S, d_out)
    return out


# ---------------------------------------------------------------------------
# Pure-JAX reference mirroring the PyTorch forward (eval mode).
# ---------------------------------------------------------------------------
def _reference(x, w_qkv, b_qkv, w_proj, b_proj, num_heads):
    B, S, _ = x.shape
    d_out = w_proj.shape[1]
    head_dim = d_out // num_heads
    scale = head_dim ** -0.5
    qkv = x @ w_qkv
    if b_qkv is not None:
        qkv = qkv + b_qkv
    qkv = qkv.reshape(B, S, 3, num_heads, head_dim)
    qkv = jnp.transpose(qkv, (2, 0, 3, 1, 4))
    q, k, v = qkv[0], qkv[1], qkv[2]
    scores = jnp.einsum("bhqd,bhkd->bhqk", q, k)
    mask = jnp.triu(jnp.ones((S, S), dtype=bool), k=1)
    scores = jnp.where(mask[None, None], -jnp.inf, scores)
    w = jax.nn.softmax(scores * scale, axis=-1)
    ctx = jnp.einsum("bhqk,bhkd->bhqd", w, v)
    ctx = jnp.transpose(ctx, (0, 2, 1, 3)).reshape(B, S, d_out)
    return ctx @ w_proj + b_proj


if __name__ == "__main__":
    # Small deterministic shapes: batch=2, seq=8, d_in=d_out=32, heads=4 (head_dim=8)
    B, S, d_in, d_out, H = 2, 8, 32, 32, 4
    key = jax.random.PRNGKey(0)
    kx, kw1, kw2, kb2 = jax.random.split(key, 4)
    x = jax.random.normal(kx, (B, S, d_in), dtype=jnp.float32)
    w_qkv = jax.random.normal(kw1, (d_in, 3 * d_out), dtype=jnp.float32) * 0.1
    w_proj = jax.random.normal(kw2, (d_out, d_out), dtype=jnp.float32) * 0.1
    b_proj = jax.random.normal(kb2, (d_out,), dtype=jnp.float32) * 0.1
    b_qkv = None  # qkv_bias=False (module default)

    out = mha_combined_qkv_forward(x, w_qkv, b_qkv, w_proj, b_proj, H)
    out = jax.block_until_ready(out)

    ref = _reference(x, w_qkv, b_qkv, w_proj, b_proj, H)
    assert out.shape == (B, S, d_out)
    assert bool(jnp.all(jnp.isfinite(out))), "non-finite values in output"
    assert jnp.allclose(out, ref, atol=1e-2, rtol=1e-2), "mismatch vs reference"

    print("KERNEL_OK")
</pallas_src>

<mosaic_0001>
module attributes {stable_mosaic.version = 11 : i64} {
  func.func @_linear_nobias_kernel(%arg0: i32, %arg1: i32, %arg2: i32, %arg3: memref<16x32xf32, #tpu.memory_space<vmem>>, %arg4: memref<32x96xf32, #tpu.memory_space<vmem>>, %arg5: memref<16x96xf32, #tpu.memory_space<vmem>>, %arg6: memref<16x96xf32, #tpu.memory_space<vmem>>) attributes {dimension_semantics = [#tpu.dimension_semantics<parallel>, #tpu.dimension_semantics<parallel>, #tpu.dimension_semantics<arbitrary>], iteration_bounds = array<i64: 1, 1, 1>, scalar_prefetch = 0 : i64, scratch_operands = 1 : i64, tpu.core_type = #tpu.core_type<tc>, window_params = [{transform_indices = @transform_0, window_bounds = array<i64: 16, 32>}, {transform_indices = @transform_1, window_bounds = array<i64: 32, 96>}, {transform_indices = @transform_2, window_bounds = array<i64: 16, 96>}]} {
    %c0_i32 = arith.constant 0 : i32
    %0 = arith.cmpi eq, %arg2, %c0_i32 : i32
    %1 = arith.extui %0 : i1 to i32
    %c0_i32_0 = arith.constant 0 : i32
    %2 = arith.cmpi ne, %1, %c0_i32_0 : i32
    scf.if %2 {
      %cst_10 = arith.constant 0.000000e+00 : f32
      %12 = vector.broadcast %cst_10 : f32 to vector<16x96xf32>
      %c0_11 = arith.constant 0 : index
      %c0_12 = arith.constant 0 : index
      %13 = vector.load %arg6[%c0_11, %c0_12] : memref<16x96xf32, #tpu.memory_space<vmem>>, vector<16x96xf32>
      tpu.vector_store %arg6[%c0_11, %c0_12], %12 {strides = array<i32>} : memref<16x96xf32, #tpu.memory_space<vmem>>, vector<16x96xf32>,
    } else {
    }
    %c0 = arith.constant 0 : index
    %c0_1 = arith.constant 0 : index
    %3 = vector.load %arg6[%c0, %c0_1] : memref<16x96xf32, #tpu.memory_space<vmem>>, vector<16x96xf32>
    %c0_2 = arith.constant 0 : index
    %c0_3 = arith.constant 0 : index
    %4 = vector.load %arg3[%c0_2, %c0_3] : memref<16x32xf32, #tpu.memory_space<vmem>>, vector<16x32xf32>
    %c0_4 = arith.constant 0 : index
    %c0_5 = arith.constant 0 : index
    %5 = vector.load %arg4[%c0_4, %c0_5] : memref<32x96xf32, #tpu.memory_space<vmem>>, vector<32x96xf32>
    %cst = arith.constant dense<0.000000e+00> : vector<16x96xf32>
    %6 = tpu.matmul %4, %5, %cst {dimension_numbers = #tpu.dot_dimension_numbers<[1], [0], [0], [1], [0, 0, 1, 1], [], []>} : vector<16x32xf32>, vector<32x96xf32>, vector<16x96xf32> -> vector<16x96xf32>
    %7 = arith.addf %3, %6 : vector<16x96xf32>
    %c0_6 = arith.constant 0 : index
    %c0_7 = arith.constant 0 : index
    %8 = vector.load %arg6[%c0_6, %c0_7] : memref<16x96xf32, #tpu.memory_space<vmem>>, vector<16x96xf32>
    tpu.vector_store %arg6[%c0_6, %c0_7], %7 {strides = array<i32>} : memref<16x96xf32, #tpu.memory_space<vmem>>, vector<16x96xf32>,
    %c0_i32_8 = arith.constant 0 : i32
    %9 = arith.cmpi eq, %arg2, %c0_i32_8 : i32
    %10 = arith.extui %9 : i1 to i32
    %c0_i32_9 = arith.constant 0 : i32
    %11 = arith.cmpi ne, %10, %c0_i32_9 : i32
    scf.if %11 {
      %c0_10 = arith.constant 0 : index
      %c0_11 = arith.constant 0 : index
      %12 = vector.load %arg6[%c0_10, %c0_11] : memref<16x96xf32, #tpu.memory_space<vmem>>, vector<16x96xf32>
      %c0_12 = arith.constant 0 : index
      %c0_13 = arith.constant 0 : index
      %13 = vector.load %arg5[%c0_12, %c0_13] : memref<16x96xf32, #tpu.memory_space<vmem>>, vector<16x96xf32>
      tpu.vector_store %arg5[%c0_12, %c0_13], %12 {strides = array<i32>} : memref<16x96xf32, #tpu.memory_space<vmem>>, vector<16x96xf32>,
    } else {
    }
    return
  }
  func.func @transform_0(%arg0: i32, %arg1: i32, %arg2: i32) -> (i32, i32) {
    %c0_i32 = arith.constant 0 : i32
    return %arg0, %arg2 : i32, i32
  }
  func.func @transform_1(%arg0: i32, %arg1: i32, %arg2: i32) -> (i32, i32) {
    %c0_i32 = arith.constant 0 : i32
    return %arg2, %arg1 : i32, i32
  }
  func.func @transform_2(%arg0: i32, %arg1: i32, %arg2: i32) -> (i32, i32) {
    %c0_i32 = arith.constant 0 : i32
    return %arg0, %arg1 : i32, i32
  }
}

</mosaic_0001>

<bundles_post_ra>
// kernel: tpu_custom_call.1
= control target key start
LH: loop header
LB: loop body
LE: loop exit
PB: predicated region body
PF: predicated region fallthrough
CT: control target
= control target key end

     0   :  { %7 = vsyncpa [#allocation4], 0  ;;  %s305_s0 = inlined_call_operand.hbm [shape: f32[16,32], index: 0, kind: input, shape index: {}]   ;;  %s306_s1 = inlined_call_operand.hbm [shape: f32[32,96], index: 1, kind: input, shape index: {}]   ;;  %s307_s2 = inlined_call_operand.hbm [shape: f32[16,96], index: 2, kind: output, shape index: {}]  }
   0x1   :  { %8 = vsyncpa [#allocation7], 0 }
   0x2   :  { %9 = vsyncpa [#allocation5], 0  ;;  %s258_s9 = smov [#allocation3]  }
   0x3   :  { %s15_s10 = sshll.u32 %s258_s9, 4  ;;  %s16_s10 = int_to_ptr.vmem [resolvable:$true] %s15_s10 }
   0x4   :  { %s200_s11 = scalar_lea.vmem %s16_s10, 256  ;;  %p205_p1 = scmp.lt.s32.totalorder %s16_s10, %s16_s10 }
   0x5   :  { %p201_p0 = scmp.ne.s32.totalorder %s16_s10, %s200_s11  ;;  %p206_p2 = scmp.lt.s32.totalorder %s200_s11, %s200_s11 }
   0x7   :  { %p207_p3 = por %p206_p2, %p205_p1 }
   0x9   :  { %p208_p4 = pnand %p207_p3, %p201_p0 }
   0xb   :  { %211 = shalt.err (!%p208_p4)
}
   0xc   :  { %s259_s12 = smov 128   ;;  %s260_s13 = smov 8  }
   0xd   :  { %21 = dma.hbm_to_vmem [thread:$0]  %s305_s0, 256, %s16_s10, [#allocation4], %s259_s12, %s259_s12, %s260_s13  }
   0xe   :  { %s261_s16 = smov [#allocation6]  }
   0xf   :  { %s27_s17 = sshll.u32 %s261_s16, 4  ;;  %s28_s17 = int_to_ptr.vmem [resolvable:$true] %s27_s17 }
  0x10   :  { %s220_s18 = scalar_lea.vmem %s28_s17, 512  ;;  %p225_p6 = scmp.lt.s32.totalorder %s28_s17, %s28_s17 }
  0x11   :  { %p221_p5 = scmp.ne.s32.totalorder %s28_s17, %s220_s18  ;;  %p226_p7 = scmp.lt.s32.totalorder %s220_s18, %s220_s18 }
  0x13   :  { %p227_p8 = por %p226_p7, %p225_p6 }
  0x15   :  { %p228_p9 = pnand %p227_p8, %p221_p5 }
  0x17   :  { %231 = shalt.err (!%p228_p9)
}
  0x18   :  { %33 = dma.hbm_to_vmem [thread:$0]  %s306_s1, 512, %s28_s17, [#allocation7], %s259_s12, %s259_s12, %s260_s13  }
  0x19   :  { %252 = dma.done.wait [#allocation4], 256  }
  0x1a   :  { %253 = vsyncadd [#allocation4], 4294967040 }
  0x1b   :  { %254 = dma.done.wait [#allocation7], 512  }
  0x1c   :  { %255 = vsyncadd [#allocation7], 4294966784  ;;  %vm44_vm0 = vcmask 785408   ;;  %v262_v0 = vmov 0.0   ;;  %vm55_vm1 = vcmask 261120   ;;  %v54_v1 = vld [vmem:[#allocation6 + $0x18] sm:$0xff] }
  0x1d   :  { %46 = vst.msk [vmem:[#allocation2 + $0x8] sm:$0xff] %vm44_vm0, %v262_v0  ;;  %45 = vst.msk [vmem:[#allocation2] sm:$0xff] %vm44_vm0, %v262_v0  ;;  %v53_v2 = vld [vmem:[#allocation6 + $0x10] sm:$0xff]  ;;  %175 = vmatprep.subr.mxu0 %v54_v1  ;;  %v52_v4 = vld [vmem:[#allocation6 + $0x8] sm:$0xff]  ;;  %s263_s0 = smov [#allocation8]  }
  0x1e   :  { %v49_v3 = vld [vmem:[#allocation3] sm:$0xff]  ;;  %176 = vmatpush3.msra.mxu0 %v54_v1  ;;  %v51_v5 = vld [vmem:[#allocation6] sm:$0xff]  ;;  %v50_v6 = vld [vmem:[#allocation3 + $0x8] sm:$0xff]  ;;  %s154_s1 = sshll.u32 %s263_s0, 4  ;;  %s155_s1 = int_to_ptr.vmem [resolvable:$true] %s154_s1 }
  0x1f   :  { %183 = vmatprep.mubr.msk.f32.mxu0 %vm55_vm1, %v49_v3  ;;  %177 = vmatprep.subr.mxu0 %v53_v2  ;;  %s232_s21 = scalar_lea.vmem %s155_s1, 256  ;;  %p237_p11 = scmp.lt.s32.totalorder %s155_s1, %s155_s1 }
  0x20   :  { %178 = vmatpush3.msra.mxu0 %v53_v2  ;;  %p233_p10 = scmp.ne.s32.totalorder %s155_s1, %s232_s21  ;;  %p238_p12 = scmp.lt.s32.totalorder %s232_s21, %s232_s21 }
  0x21   :  { %179 = vmatprep.subr.mxu0 %v52_v4 }
  0x22   :  { %180 = vmatpush3.msra.mxu0 %v52_v4  ;;  %p239_p13 = por %p238_p12, %p237_p11 }
  0x23   :  { %181 = vmatprep.subr.mxu0 %v51_v5 }
  0x24   :  { %182 = vmatpush3.msra.mxu0 %v51_v5  ;;  %v48_v7 = vld [vmem:[#allocation2 + $0x8] sm:$0xff]  ;;  %v47_v9 = vld [vmem:[#allocation2] sm:$0xff]  ;;  %p240_p0 = pnand %p239_p13, %p233_p10 }
  0x25   :  { %184 = vmatmul.mubr.msk.f32.vlgmr.msra.gmra.mxu0 %vm55_vm1, %v50_v6 }
  0xe5   :  { %v185_v8 = vpop.f32.mrf.mxu0 }
  0xe6   :  { %v138_v10 = vadd.f32 %v185_v8, %v48_v7 }
  0xe7   :  { %v128_v11 = vpop.f32.mrf.mxu0 }
  0xe8   :  { %141 = vst.msk [vmem:[#allocation2 + $0x8] sm:$0xff] %vm44_vm0, %v138_v10  ;;  %v137_v12 = vadd.f32 %v128_v11, %v47_v9 }
  0xea   :  { %140 = vst.msk [vmem:[#allocation2] sm:$0xff] %vm44_vm0, %v137_v12 }
  0xef   :  { %v146_v13 = vld [vmem:[#allocation2 + $0x8] sm:$0xff] }
  0xf0   :  { %148 = vst.msk [vmem:[#allocation8 + $0x8] sm:$0xff] %vm44_vm0, %v146_v13 }
  0xf1   :  { %v145_v14 = vld [vmem:[#allocation2] sm:$0xff] }
  0xf2   :  { %147 = vst.msk [vmem:[#allocation8] sm:$0xff] %vm44_vm0, %v145_v14 }
  0xf3   :  { %243 = shalt.err (!%p240_p0)
}
  0xf4   :  { %160 = dma.vmem_to_hbm [thread:$0]  %s155_s1, 256, %s307_s2, [#allocation5], %s259_s12, %s259_s12, %s260_s13  }
  0xf5   :  { %256 = dma.done.wait [#allocation5], 256  }
  0xf6   :  { %257 = vsyncadd [#allocation5], 4294967040 }
  0xf7   :  { %164 = vsyncpa [#allocation4], 1 }
  0xf8   :  { %165 = vsyncpa [#allocation7], 1 }
  0xf9   :  { %166 = vsyncpa [#allocation5], 1 }

</bundles_post_ra>
